<compile_context>
chip_gen: v7x
topology: tpu7x:2x2x1
jax: 0.10.0
libtpu: 0.0.40
codegen_flags: <defaults>
</compile_context>

<pallas_src>
import jax
import jax.numpy as jnp
from jax.experimental import pallas as pl
from jax.experimental.pallas import tpu as pltpu

LANE = 128            # vreg lane width
MAX_TILE_ROWS = 4096  # 4096 rows * 128 lanes * 4B = 2 MiB per f32 half-buffer
MIN_GRID_STEPS = 8    # target number of pipeline steps (when data allows)


def glu_kernel(x_ref, o_ref):
    # x_ref: (2, tile_rows, 128) fused tile -- [0] = value half, [1] = gate half.
    # o_ref: (tile_rows, 128).
    a = x_ref[0].astype(jnp.float32)
    b = x_ref[1].astype(jnp.float32)
    gate = 1.0 / (1.0 + jnp.exp(-b))          # exact sigmoid; exp on the EUP
    o_ref[...] = (a * gate).astype(o_ref.dtype)


def glu_custom_forward(x):
    """x: (N, C, H, W) with C even. Returns (N, C//2, H, W)."""
    N, C, H, W = x.shape
    assert C % 2 == 0, "channels dont divide 2!"
    nc = C // 2
    F = nc * H * W                            # flat elements per half, per batch item

    # (N, C, H, W) -> (N, 2, F): contiguous, free reshape; [:, 0]=value, [:, 1]=gate.
    x_flat = x.reshape(N, 2, F)

    # Pad only up to the next lane (128) boundary -- a no-op for aligned shapes.
    f_pad = ((F + LANE - 1) // LANE) * LANE
    if f_pad != F:
        x_flat = jnp.pad(x_flat, ((0, 0), (0, 0), (0, f_pad - F)))
    rows = f_pad // LANE
    x_r = x_flat.reshape(N, 2, rows, LANE)

    # Pick tile_rows: big tiles (amortize per-step overhead) but enough grid steps
    # to keep the pipeline / both v7x TensorCores busy.
    if rows <= 8:
        tile_rows = rows                      # full extent (legal even if < 8)
    else:
        want_tiles = max(1, -(-MIN_GRID_STEPS // N))          # ceil(MIN_GRID_STEPS / N)
        tile_rows = min(MAX_TILE_ROWS, max(8, rows // want_tiles))
        tile_rows = max(8, (tile_rows // 8) * 8)              # keep (8,128)-aligned
    num_row_tiles = pl.cdiv(rows, tile_rows)  # ragged last block is masked by Pallas
    grid = (N, num_row_tiles)

    out_r = pl.pallas_call(
        glu_kernel,
        out_shape=jax.ShapeDtypeStruct((N, rows, LANE), x.dtype),
        grid=grid,
        in_specs=[
            # Fused value+gate tile: one rectangular DMA per grid step.
            pl.BlockSpec((None, 2, tile_rows, LANE), lambda i, j: (i, 0, j, 0)),
        ],
        out_specs=pl.BlockSpec((None, tile_rows, LANE), lambda i, j: (i, j, 0)),
        compiler_params=pltpu.CompilerParams(
            dimension_semantics=("parallel", "parallel"),
            vmem_limit_bytes=40 * 1024 * 1024,
        ),
    )(x_r)

    out = out_r.reshape(N, f_pad)
    if f_pad != F:
        out = out[:, :F]
    return out.reshape(N, nc, H, W)


def glu_reference(x):
    nc = x.shape[1] // 2
    return x[:, :nc] * jax.nn.sigmoid(x[:, nc:])


if __name__ == "__main__":
    key = jax.random.PRNGKey(0)
    # Small NCHW input consistent with the module: batch=2, channels=4, 16x16.
    x = jax.random.normal(key, (2, 4, 16, 16), dtype=jnp.float32)

    out = glu_custom_forward(x)
    out = jax.block_until_ready(out)

    ref = glu_reference(x)
    assert out.shape == (2, 2, 16, 16)
    assert jnp.allclose(out, ref, atol=1e-5, rtol=1e-5)

    print("KERNEL_OK")
</pallas_src>

<mosaic_0001>
module attributes {stable_mosaic.version = 11 : i64} {
  func.func @glu_kernel(%arg0: i32, %arg1: i32, %arg2: memref<1x2x4x128xf32, #tpu.memory_space<vmem>>, %arg3: memref<1x4x128xf32, #tpu.memory_space<vmem>>) attributes {dimension_semantics = [#tpu.dimension_semantics<parallel>, #tpu.dimension_semantics<parallel>], iteration_bounds = array<i64: 2, 1>, scalar_prefetch = 0 : i64, scratch_operands = 0 : i64, tpu.core_type = #tpu.core_type<tc>, window_params = [{transform_indices = @transform_0, window_bounds = array<i64: 1, 2, 4, 128>}, {transform_indices = @transform_1, window_bounds = array<i64: 1, 4, 128>}]} {
    %c0 = arith.constant 0 : index
    %c0_0 = arith.constant 0 : index
    %c0_1 = arith.constant 0 : index
    %c0_2 = arith.constant 0 : index
    %0 = vector.load %arg2[%c0, %c0_0, %c0_1, %c0_2] : memref<1x2x4x128xf32, #tpu.memory_space<vmem>>, vector<1x1x4x128xf32>
    %1 = vector.shape_cast %0 : vector<1x1x4x128xf32> to vector<4x128xf32>
    %c0_3 = arith.constant 0 : index
    %c1 = arith.constant 1 : index
    %c0_4 = arith.constant 0 : index
    %c0_5 = arith.constant 0 : index
    %2 = vector.load %arg2[%c0_3, %c1, %c0_4, %c0_5] : memref<1x2x4x128xf32, #tpu.memory_space<vmem>>, vector<1x1x4x128xf32>
    %3 = vector.shape_cast %2 : vector<1x1x4x128xf32> to vector<4x128xf32>
    %cst = arith.constant 0.000000e+00 : f32
    %4 = vector.broadcast %cst : f32 to vector<4x128xf32>
    %5 = arith.subf %4, %3 : vector<4x128xf32>
    %6 = math.exp %5 : vector<4x128xf32>
    %cst_6 = arith.constant 1.000000e+00 : f32
    %7 = vector.broadcast %cst_6 : f32 to vector<4x128xf32>
    %8 = arith.addf %7, %6 : vector<4x128xf32>
    %cst_7 = arith.constant 1.000000e+00 : f32
    %9 = vector.broadcast %cst_7 : f32 to vector<4x128xf32>
    %10 = arith.divf %9, %8 : vector<4x128xf32>
    %11 = arith.mulf %1, %10 : vector<4x128xf32>
    %c0_8 = arith.constant 0 : index
    %c0_9 = arith.constant 0 : index
    %c0_10 = arith.constant 0 : index
    %12 = vector.load %arg3[%c0_8, %c0_9, %c0_10] : memref<1x4x128xf32, #tpu.memory_space<vmem>>, vector<1x4x128xf32>
    %13 = vector.shape_cast %12 : vector<1x4x128xf32> to vector<4x128xf32>
    %14 = vector.shape_cast %11 : vector<4x128xf32> to vector<1x4x128xf32>
    tpu.vector_store %arg3[%c0_8, %c0_9, %c0_10], %14 {strides = array<i32>} : memref<1x4x128xf32, #tpu.memory_space<vmem>>, vector<1x4x128xf32>,
    return
  }
  func.func @transform_0(%arg0: i32, %arg1: i32) -> (i32, i32, i32, i32) {
    %c0_i32 = arith.constant 0 : i32
    %c0_i32_0 = arith.constant 0 : i32
    %c0_i32_1 = arith.constant 0 : i32
    return %arg0, %c0_i32, %arg1, %c0_i32_0 : i32, i32, i32, i32
  }
  func.func @transform_1(%arg0: i32, %arg1: i32) -> (i32, i32, i32) {
    %c0_i32 = arith.constant 0 : i32
    %c0_i32_0 = arith.constant 0 : i32
    return %arg0, %arg1, %c0_i32 : i32, i32, i32
  }
}

</mosaic_0001>

<bundles_post_ra>
// kernel: tpu_custom_call.1
= control target key start
LH: loop header
LB: loop body
LE: loop exit
PB: predicated region body
PF: predicated region fallthrough
CT: control target
= control target key end

     0   :  { %6 = vsyncpa [#allocation3], 0  ;;  %s645_s0 = inlined_call_operand.hbm [shape: f32[2,2,4,128], index: 0, kind: input, shape index: {}]   ;;  %s646_s1 = inlined_call_operand.hbm [shape: f32[2,4,128], index: 1, kind: output, shape index: {}]  }
   0x1   :  { %8 = vsyncpa [#allocation3 + $0x1], 0 }
   0x2   :  { %9 = vsyncpa [#allocation4], 0 }
   0x3   :  { %11 = vsyncpa [#allocation4 + $0x1], 0  ;;  %s471_s6 = smov 0   ;;  %s473_s7 = smov 0  }
   0x4   :  { %s475_s8 = smov 0   ;;  %s477_s9 = smov 0  }
   0x5   :  { %s479_s10 = smov 0   ;;  %s481_s11 = smov 0  }
   0x6 LB: > { %s259_s12 = sadd.s32 4294967295, %s455_s11   ;;  %s260_s13 = sadd.s32 4294967294, %s455_s11   ;;  %s455_s11 = sphi %s481_s11, %s17_s11   ;;  %s451_s10 = sphi %s479_s10, %s661_s10   ;;  %s447_s9 = sphi %s477_s9, %s660_s9   ;;  %s443_s8 = sphi %s475_s8, %s659_s8   ;;  %s439_s7 = sphi %s473_s7, %s658_s7   ;;  %s435_s6 = sphi %s471_s6, %s657_s6  }
   0x7   : > { %s29_s14 = sadd.s32 1, %s451_s10  ;;  %s38_s15 = sadd.s32 1, %s443_s8 }
   0x8   : > { %p31_p0 = scmp.ge.s32.totalorder %s29_s14, 2  ;;  %p45_p1 = scmp.ne.s32.totalorder %s443_s8, %s439_s7 }
   0x9   : > { %p46_p2 = scmp.eq.s32.totalorder %s455_s11, 0  ;;  %p51_p3 = scmp.ne.s32.totalorder %s439_s7, %s435_s6 }
   0xa   : > { %s663_s14 = smov (%p31_p0, %s29_s14), 0  ;;  %p52_p5 = scmp.eq.s32.totalorder %s259_s12, 0 }
   0xb   : > { %p512_p4 = por %p46_p2, %p45_p1  ;;  %s33_s17 = ssub.s32 %s451_s10, %s663_s14 }
   0xc   : > { %p77_p6 = scmp.eq.s32.totalorder %s259_s12, 1  ;;  %p36_p7 = scmp.eq.s32.totalorder %s33_s17, 0 }
   0xd   : > { %p518_p8 = por %p52_p5, %p51_p3  ;;  %p83_p10 = scmp.eq.s32.totalorder %s260_s13, 1 }
   0xe   : > { %p522_p9 = por %p77_p6, %p45_p1  ;;  %p287_p13 = scmp.lt.s32.totalorder %s455_s11, 2 }
   0xf   : > { %s527_s20 = scalar_select %p36_p7, %s443_s8, %s38_s15  }
  0x10   : > { %s650_s19 = scalar_select %p522_p9, 1, 0 }
  0x11   : > { %p529_p11 = por %p83_p10, %p51_p3  ;;  %s103_s22 = sand.u32 1, %s443_s8  }
  0x12   : > { %s263_s23 = sshll.u32 %s103_s22, 3  ;;  %s274_s24 = sshll.u32 %s451_s10, 7 }
  0x13   : > { %s651_s21 = scalar_select %p529_p11, 1, 0 }
  0x14   : > { %s540_s27 = scalar_lea.hbm %s645_s0, %s274_s24  ;;  %s107_s28 = scalar_lea.vmem [#allocation2], %s263_s23 }
  0x15   : > { %s115_s29 = sshll.u32 %s107_s28, 4  ;;  %p546_p0 = pnand %p287_p13, %p512_p4  ;;  %s542_s29 = int_to_ptr.vmem [resolvable:$true] %s115_s29 }
  0x16   : > { %s551_s2 = scalar_lea.sflag [#allocation3], %s103_s22  ;;  %s343_s3 = scalar_lea.hbm %s540_s27, 128 }
  0x17   : > { %p344_p2 = scmp.ne.s32.totalorder %s540_s27, %s343_s3  ;;  %p345_p3 = pneg %p546_p0 }
  0x18   : > { %s348_s12 = scalar_lea.hbm %s645_s0, 256  ;;  %p349_p4 = scmp.lt.u32.totalorder %s540_s27, %s645_s0 }
  0x19   : > { %p346_p5 = pnand %p345_p3, %p344_p2  ;;  %p350_p7 = scmp.lt.u32.totalorder %s348_s12, %s343_s3 }
  0x1a   : > { %p352_p13 = scmp.lt.u32.totalorder %s343_s3, %s540_s27 }
  0x1b   : > { %p347_p6 = pneg %p346_p5  ;;  %p351_p10 = por %p350_p7, %p349_p4 }
  0x1d   : > { %p353_p12 = por %p352_p13, %p351_p10 }
  0x1f   : > { %p354_p1 = pnand %p353_p12, %p347_p6 }
  0x21   : > { %357 = shalt.err (!%p354_p1)
}
  0x22   : > { %s358_s16 = scalar_lea.vmem %s542_s29, 128  ;;  %s457_s17 = smov [#allocation2]  }
  0x23   : > { %p359_p2 = scmp.ne.s32.totalorder %s542_s29, %s358_s16  ;;  %s363_s22 = sshll.u32 %s457_s17, 4  ;;  %s364_s22 = int_to_ptr.vmem [resolvable:$false] %s363_s22 }
  0x24   : > { %s365_s23 = scalar_lea.vmem %s364_s22, 256  ;;  %p366_p9 = scmp.lt.s32.totalorder %s542_s29, %s364_s22 }
  0x25   : > { %p361_p5 = pnand %p359_p2, %p345_p3  ;;  %p367_p4 = scmp.lt.s32.totalorder %s365_s23, %s358_s16 }
  0x27   : > { %p362_p11 = pneg %p361_p5  ;;  %p368_p7 = por %p367_p4, %p366_p9 }
  0x29   : > { %p369_p10 = pnand %p368_p7, %p362_p11 }
  0x2b   : > { %372 = shalt.err (!%p369_p10)
}
  0x2c   : > { %s458_s24 = smov 64   ;;  %s459_s25 = smov 4  }
  0x2d   : > { %282 = dma.hbm_to_vmem [thread:$0]  (!%p546_p0), %s540_s27, 128, %s542_s29, %s551_s2, %s458_s24, %s458_s24, %s459_s25  }
  0x2e   : > { %p123_p12 = scmp.lt.s32.totalorder %s455_s11, 3  ;;  %p653_p1 = scmp.ge.s32.totalorder %s455_s11, 1 }
  0x30   : > { %p124_p3 = pnand %p653_p1, %p123_p12 }
  0x31   : > { %s583_s26 = sand.u32 (!%p124_p3), 1, %s439_s7  }
  0x32   : > { %127 = sbr.rel (%p124_p3) target bundleno = 103 (0x67), region = 24  ;;  %s267_s28 = sshll.u32 (!%p124_p3), %s583_s26, 3 }
  0x33   : > { %s130_s3 = scalar_lea.sflag (!%p124_p3), [#allocation3], %s583_s26  ;;  %s133_s4 = scalar_lea.vmem (!%p124_p3), [#allocation2], %s267_s28 }
  0x39   : > { %426 = dma.done.wait (%p518_p8), %s130_s3, 128  }
  0x3a   : > { %428 = vsyncadd (%p518_p8), %s130_s3, 4294967168  ;;  %v269_v0 = vld [vmem:[%s133_s4 + $0x4] sm:$0xf]  ;;  %s268_s27 = sshll.u32 %s583_s26, 2  ;;  %v152_v5 = vld [vmem:[%s133_s4] sm:$0xf] }
  0x3b   : > { %v155_v1 = vsub.f32 0.0, %v269_v0  ;;  %s151_s29 = scalar_lea.vmem [#allocation5], %s268_s27  ;;  %s271_s2 = sshll.u32 %s447_s9, 6 }
  0x3c   : > { %s178_s30 = sshll.u32 %s151_s29, 4  ;;  %s598_s12 = scalar_lea.hbm %s646_s1, %s271_s2  ;;  %s593_s30 = int_to_ptr.vmem [resolvable:$true] %s178_s30 }
  0x3d   : > { %v156_v2 = vmul.f32 1.442695, %v155_v1  ;;  %s164_s13 = scalar_lea.sflag [#allocation4], %s583_s26  ;;  %s373_s15 = scalar_lea.vmem %s593_s30, 64 }
  0x3e   : > { %p374_p8 = scmp.ne.s32.totalorder %s593_s30, %s373_s15  ;;  %p654_p9 = scmp.ne.s32.totalorder %s650_s19, 0 }
  0x3f   : > { %339 = vpow2.f32 %v156_v2  ;;  %s460_s9 = smov [#allocation5]  }
  0x40   : > { %p375_p11 = pnand %p374_p8, %p654_p9  ;;  %s377_s16 = sshll.u32 %s460_s9, 4  ;;  %s378_s16 = int_to_ptr.vmem [resolvable:$false] %s377_s16 }
  0x41   : > { %s379_s17 = scalar_lea.vmem %s378_s16, 128  ;;  %p380_p6 = scmp.lt.s32.totalorder %s593_s30, %s378_s16 }
  0x42   : > { %p376_p0 = pneg %p375_p11  ;;  %p381_p13 = scmp.lt.s32.totalorder %s379_s17, %s373_s15 }
  0x44   : > { %p382_p2 = por %p381_p13, %p380_p6 }
  0x46   : > { %p383_p5 = pnand %p382_p2, %p376_p0 }
  0x49   : > { %v340_v3 = vpop.eup %339 }
  0x4a   : > { %v158_v4 = vadd.f32 1.0, %v340_v3 }
  0x4c   : > { %341 = vrcp.f32 %v158_v4 }
  0x56   : > { %v342_v6 = vpop.eup %341 }
  0x57   : > { %v161_v7 = vmul.f32 %v342_v6, %v152_v5 }
  0x59   : > { %162 = vst [vmem:[%s151_s29] sm:$0xf] %v161_v7 }
  0x5a   : > { %386 = shalt.err (!%p383_p5)
}
  0x5b   : > { %s387_s22 = scalar_lea.hbm %s598_s12, 64  ;;  %s391_s25 = scalar_lea.hbm %s646_s1, 128 }
  0x5c   : > { %p388_p4 = scmp.ne.s32.totalorder %s598_s12, %s387_s22  ;;  %p392_p12 = scmp.lt.u32.totalorder %s598_s12, %s646_s1 }
  0x5d   : > { %p393_p1 = scmp.lt.u32.totalorder %s391_s25, %s387_s22  ;;  %p395_p8 = scmp.lt.u32.totalorder %s387_s22, %s598_s12 }
  0x5e   : > { %p389_p7 = pnand %p388_p4, %p654_p9 }
  0x5f   : > { %p394_p3 = por %p393_p1, %p392_p12 }
  0x60   : > { %p390_p10 = pneg %p389_p7 }
  0x61   : > { %p396_p11 = por %p395_p8, %p394_p3 }
  0x63   : > { %p397_p0 = pnand %p396_p11, %p390_p10 }
  0x65   : > { %400 = shalt.err (!%p397_p0)
}
  0x66   : > { %277 = dma.vmem_to_hbm [thread:$0]  (%p654_p9), %s593_s30, 64, %s598_s12, %s164_s13  }
  0x67 PF: > { %s190_s3 = sand.u32 1, %s435_s6   ;;  %p655_p6 = scmp.ne.s32.totalorder %s651_s21, 0 }
  0x68   : > { %p656_p13 = scmp.ge.s32.totalorder %s455_s11, 2  ;;  %s191_s4 = scalar_lea.sflag [#allocation4], %s190_s3 }
  0x6a   : > { %p284_p2 = pnand %p656_p13, %p655_p6 }
  0x6c   : > { %430 = dma.done.wait (!%p284_p2), %s191_s4, 64  }
  0x6d   : > { %432 = vsyncadd (!%p284_p2), %s191_s4, 4294967232  ;;  %s17_s11 = sadd.s32 1, %s455_s11   ;;  %s657_s6 = smov %s439_s7 }
  0x6e   : > { %p14_p5 = scmp.ge.s32.totalorder %s17_s11, 4   ;;  %s658_s7 = smov %s443_s8 }
  0x6f   : > { %s659_s8 = smov %s527_s20  ;;  %s660_s9 = smov %s451_s10 }
  0x70   : > { %s661_s10 = smov %s663_s14  ;;  %16 = sbr.rel (!%p14_p5) target bundleno = 6 (0x6), region = 70 }
  0x77   :  { %196 = vsyncpa [#allocation3], 1 }
  0x78   :  { %198 = vsyncpa [#allocation3 + $0x1], 1 }
  0x79   :  { %199 = vsyncpa [#allocation4], 1 }
  0x7a   :  { %201 = vsyncpa [#allocation4 + $0x1], 1 }

</bundles_post_ra>
